<compile_context>
chip_gen: v5e
topology: v5e:2x2
jax: 0.10.0
libtpu: 0.0.40
codegen_flags: <defaults>
</compile_context>

<pallas_src>
import functools

import jax
import jax.numpy as jnp
from jax import lax
from jax.experimental import pallas as pl
from jax.experimental.pallas import tpu as pltpu


# ----------------------------------------------------------------------------
# Helpers
# ----------------------------------------------------------------------------
def _round_up(x, m):
    return (x + m - 1) // m * m


def _tpu_hints():
    """Best-effort generation hints: (scoped-VMEM tile budget, prefer even grid).

    v5e: 16 MiB scoped default -> conservative 12 MiB budget.
    v6e: 32 MiB default / 128 MiB physical -> 24 MiB budget.
    v7x: 64 MiB/TC physical, 2 TensorCores -> 20 MiB budget + even grid so the
         "parallel" grid axis splits evenly across the two cores.
    """
    try:
        kind = jax.devices()[0].device_kind.lower()
    except Exception:
        kind = ""
    if "v5 lite" in kind or "v5e" in kind or "v5lite" in kind:
        return 12 * (1 << 20), False
    if "v6" in kind:
        return 24 * (1 << 20), False
    if "v7" in kind or "7x" in kind:
        return 20 * (1 << 20), True
    return 12 * (1 << 20), False            # unknown generation: be conservative


_TILE_P_CANDIDATES = (1024, 512, 256, 128)


def _vmem_need(tile_p, Kd, Np, a_bytes, b_bytes):
    # double-buffered A tile + (worst-case double-buffered) resident weight +
    # double-buffered f32 output tile + bias + 1 MiB fudge for compiler scratch.
    return (2 * tile_p * Kd * a_bytes
            + 2 * Kd * Np * b_bytes
            + 2 * tile_p * Np * 4
            + 2 * Np * 4
            + (1 << 20))


def _choose_tile_p(P, Kd, Np, a_bytes, b_bytes):
    budget, even_grid = _tpu_hints()
    fitting = [t for t in _TILE_P_CANDIDATES
               if _vmem_need(t, Kd, Np, a_bytes, b_bytes) <= budget]
    if not fitting:
        fitting = [_TILE_P_CANDIDATES[-1]]
    tile = fitting[0]                        # largest tile that fits the budget
    if even_grid:
        # v7x megacore: prefer the largest fitting tile that yields an even
        # (>=2) number of grid steps to balance the two TensorCores.
        for t in fitting:
            g = -(-P // t)
            if g >= 2 and g % 2 == 0:
                tile = t
                break
    # Never pick a tile bigger than the row-padded problem itself.
    return max(128, min(tile, _round_up(P, 128)))


# ----------------------------------------------------------------------------
# Pallas kernels: lane-dense tiled matmul (optionally + bias), f32 accumulation
# ----------------------------------------------------------------------------
def _matmul_kernel(a_ref, b_ref, o_ref):
    o_ref[...] = jnp.dot(
        a_ref[...], b_ref[...], preferred_element_type=jnp.float32
    ).astype(o_ref.dtype)


def _matmul_bias_kernel(a_ref, b_ref, bias_ref, o_ref):
    acc = jnp.dot(a_ref[...], b_ref[...], preferred_element_type=jnp.float32)
    o_ref[...] = (acc + bias_ref[...]).astype(o_ref.dtype)


def _tiled_matmul(a, b, bias=None):
    """a: (P, Kd) bf16/f32, b: (Kd, Np) with Np % 128 == 0, bias: (1, Np) f32.

    Row-tiled, lane-dense GEMM with f32 accumulation and f32 output.  Rows are
    zero-padded internally to a tile multiple; the caller slices back to P.
    """
    P, Kd = a.shape
    Np = b.shape[1]
    a_bytes = a.dtype.itemsize
    b_bytes = b.dtype.itemsize
    tile_p = _choose_tile_p(P, Kd, Np, a_bytes, b_bytes)
    Pp = _round_up(P, tile_p)
    if Pp != P:
        a = jnp.pad(a, ((0, Pp - P), (0, 0)))

    in_specs = [
        pl.BlockSpec((tile_p, Kd), lambda i: (i, 0)),
        pl.BlockSpec((Kd, Np), lambda i: (0, 0)),     # grid-invariant resident weight
    ]
    args = (a, b)
    kern = _matmul_kernel
    if bias is not None:
        in_specs.append(pl.BlockSpec((1, Np), lambda i: (0, 0)))
        args = (a, b, bias)
        kern = _matmul_bias_kernel

    # Explicit VMEM limit: above every generation's scoped default, below v7x's
    # 64 MiB/TC physical capacity.
    vmem_limit = int(min(48 << 20,
                         max(32 << 20,
                             2 * _vmem_need(tile_p, Kd, Np, a_bytes, b_bytes))))

    out = pl.pallas_call(
        kern,
        out_shape=jax.ShapeDtypeStruct((Pp, Np), jnp.float32),
        grid=(Pp // tile_p,),
        in_specs=in_specs,
        out_specs=pl.BlockSpec((tile_p, Np), lambda i: (i, 0)),
        compiler_params=pltpu.CompilerParams(
            dimension_semantics=("parallel",),
            vmem_limit_bytes=vmem_limit),
    )(*args)
    return out[:P]


# ----------------------------------------------------------------------------
# XLA glue: deformable sampling (gather + pre-scaled bilinear combine)
# ----------------------------------------------------------------------------
def _bilinear_sample(x, off, kH, kW, groups, pad, compute_dtype=jnp.float32):
    """x: (N,C,H,W) f32; off: (N,H,W,G,K,2) f32 [dy,dx] -> (P, G*K*Cg).

    Position math stays f32; the gathered pixels and pre-scaled corner weights
    are cast to `compute_dtype` before the 4-corner combine, so with bf16 the
    big sampled-activation tensor never touches HBM in f32.
    """
    N, C, H, W = x.shape
    G, K, Cg = groups, kH * kW, C // groups
    P = N * H * W
    dy = off[..., 0]
    dx = off[..., 1]                                                # (N,H,W,G,K)
    hg = jnp.arange(H, dtype=jnp.float32)[None, :, None, None, None]
    wg = jnp.arange(W, dtype=jnp.float32)[None, None, :, None, None]
    ki = (jnp.arange(K) // kW).astype(jnp.float32)[None, None, None, None, :]
    kj = (jnp.arange(K) % kW).astype(jnp.float32)[None, None, None, None, :]
    py = hg - pad + ki + dy
    px = wg - pad + kj + dx
    y0 = jnp.floor(py)
    x0 = jnp.floor(px)
    lh = py - y0
    lw = px - x0
    hh = 1.0 - lh
    hw = 1.0 - lw
    valid = (py > -1) & (py < H) & (px > -1) & (px < W)

    xg = x.reshape(N, G, Cg, H * W).astype(compute_dtype)
    b_ix = jnp.arange(N)[:, None, None, None, None, None]
    g_ix = jnp.arange(G)[None, None, None, :, None, None]
    c_ix = jnp.arange(Cg)[None, None, None, None, None, :]

    def corner(yc, xc, wgt):
        inb = valid & (yc >= 0) & (yc <= H - 1) & (xc >= 0) & (xc <= W - 1)
        yi = jnp.clip(yc, 0, H - 1).astype(jnp.int32)
        xi = jnp.clip(xc, 0, W - 1).astype(jnp.int32)
        s_ix = (yi * W + xi)[..., None]                             # (N,H,W,G,K,1)
        w = (wgt * inb.astype(jnp.float32))[..., None].astype(compute_dtype)
        return w * xg[b_ix, g_ix, c_ix, s_ix]                       # (N,H,W,G,K,Cg)

    val = (corner(y0, x0, hh * hw) + corner(y0, x0 + 1, hh * lw)
           + corner(y0 + 1, x0, lh * hw) + corner(y0 + 1, x0 + 1, lh * lw))
    return val.reshape(P, G * K * Cg)                               # (g,k,c)-major


def _grouped_weight(deform_w, groups, kH, kW):
    outC, Cg = deform_w.shape[0], deform_w.shape[1]
    G, K, Cog = groups, kH * kW, outC // groups
    # (G, Cog, Cg, K) -> (G, K, Cg, Cog) -> (G, K*Cg, Cog)   (k-major, c-minor)
    return jnp.transpose(deform_w.reshape(G, Cog, Cg, K), (0, 3, 2, 1)).reshape(
        G, K * Cg, Cog)


def _block_diag_weight(deform_w, groups, kH, kW, out_pad):
    """Block-diagonal (G*K*Cg, out_pad) weight for one wide lane-dense matmul."""
    outC = deform_w.shape[0]
    G, K = groups, kH * kW
    Cog = outC // G
    wg = _grouped_weight(deform_w, groups, kH, kW)                  # (G, K*Cg, Cog)
    KCg = wg.shape[1]
    wbd = jnp.zeros((G * KCg, out_pad), dtype=deform_w.dtype)
    for g in range(G):
        wbd = wbd.at[g * KCg:(g + 1) * KCg, g * Cog:(g + 1) * Cog].set(wg[g])
    return wbd


# ----------------------------------------------------------------------------
# Full forward (Pallas path)
# ----------------------------------------------------------------------------
def deformable_conv_forward(x, offset_w, deform_w, deform_b, *,
                            kH=3, kW=3, groups=4, pad=1):
    N, C, H, W = x.shape
    G, K = groups, kH * kW
    outC = deform_w.shape[0]
    P = N * H * W

    # ---- offset conv (dense 3x3, pad=1): NHWC im2col (bf16) + Pallas GEMM ----
    # Columns and weights are bf16 (halves the dominant A-stream HBM bytes and
    # avoids multi-pass f32 MXU emulation); accumulation stays f32 so the
    # offsets keep full precision.
    # TODO(synk): fold the 9 im2col taps into a trailing 'arbitrary' grid axis
    # (element-offset windows / manual DMA + pl.when-accumulator) so the
    # (P, 9C) column matrix never round-trips HBM at all.
    x_nhwc = jnp.transpose(x, (0, 2, 3, 1))                         # (N,H,W,C)
    xp = jnp.pad(x_nhwc, ((0, 0), (pad, pad), (pad, pad), (0, 0))).astype(jnp.bfloat16)
    cols = jnp.concatenate(
        [xp[:, i:i + H, j:j + W, :] for i in range(kH) for j in range(kW)],
        axis=-1).reshape(P, K * C)                                  # (P, K*C) bf16, (k,c)-major
    offC = offset_w.shape[0]
    offN = _round_up(offC, 128)                                     # lane-dense output
    w_off = jnp.transpose(offset_w, (2, 3, 1, 0)).reshape(K * C, offC)
    w_off = jnp.pad(w_off, ((0, 0), (0, offN - offC))).astype(jnp.bfloat16)
    offset = _tiled_matmul(cols, w_off)[:, :offC]                   # (P, offC) f32

    # ---- deformable sampling: XLA gather + bf16 bilinear corner combine ----
    # Offset layout per group: per kernel point, [dy, dx] (torchvision order).
    off = offset.reshape(N, H, W, G, K, 2)
    val = _bilinear_sample(x, off, kH, kW, G, pad,
                           compute_dtype=jnp.bfloat16)              # (P, G*K*Cg) bf16

    # ---- grouped conv as one block-diagonal lane-dense MXU GEMM + bias ----
    # Block-diag wastes G x FLOPs vs a true grouped conv (free while HBM-bound);
    # revisit with a per-group grid axis if outC/G ever grows past ~256 lanes
    # (matters first on v5e's slower MXU).
    outN = _round_up(outC, 128)
    w_bd = _block_diag_weight(deform_w, G, kH, kW, outN).astype(jnp.bfloat16)
    bias = jnp.pad(deform_b, (0, outN - outC)).reshape(1, outN).astype(jnp.float32)
    out_pf = _tiled_matmul(val, w_bd, bias)[:, :outC]               # (P, outC) f32

    # TODO(synk): the module contract is NCHW; if the consumer accepts NHWC this
    # final full-tensor transpose (pure HBM traffic) can be dropped.
    return out_pf.reshape(N, H, W, outC).transpose(0, 3, 1, 2)      # NCHW f32


# ----------------------------------------------------------------------------
# All-f32 reference (XLA) for correctness check of the bf16 Pallas pipeline
# ----------------------------------------------------------------------------
def reference_forward(x, offset_w, deform_w, deform_b, *, kH=3, kW=3,
                      groups=4, pad=1):
    N, C, H, W = x.shape
    G, K = groups, kH * kW
    outC = deform_w.shape[0]
    P = N * H * W
    offset = lax.conv_general_dilated(
        x, offset_w, (1, 1), ((pad, pad), (pad, pad)),
        dimension_numbers=('NCHW', 'OIHW', 'NCHW'))
    off = jnp.transpose(offset, (0, 2, 3, 1)).reshape(N, H, W, G, K, 2)
    val = _bilinear_sample(x, off, kH, kW, G, pad,
                           compute_dtype=jnp.float32)               # (P, G*K*Cg) f32
    wg = _grouped_weight(deform_w, G, kH, kW)                       # (G, K*Cg, Cog)
    Cg = C // G
    out = jnp.einsum('pgi,gio->pgo', val.reshape(P, G, K * Cg), wg).reshape(
        P, outC) + deform_b[None, :]
    return out.reshape(N, H, W, outC).transpose(0, 3, 1, 2)


if __name__ == "__main__":
    N, inC, outC, H, W = 2, 8, 8, 16, 16
    kH = kW = 3
    G = 4  # num_deformable_groups (== conv groups in this module)

    key = jax.random.PRNGKey(0)
    kx, kw1, kw2, kb = jax.random.split(key, 4)
    x = jax.random.normal(kx, (N, inC, H, W), dtype=jnp.float32)
    offset_w = 0.05 * jax.random.normal(kw1, (G * 2 * kH * kW, inC, kH, kW),
                                        dtype=jnp.float32)
    deform_w = 0.1 * jax.random.normal(kw2, (outC, inC // G, kH, kW),
                                       dtype=jnp.float32)
    deform_b = 0.1 * jax.random.normal(kb, (outC,), dtype=jnp.float32)

    fwd = jax.jit(functools.partial(deformable_conv_forward,
                                    kH=kH, kW=kW, groups=G))
    out = jax.block_until_ready(fwd(x, offset_w, deform_w, deform_b))
    assert out.shape == (N, outC, H, W)

    ref = jax.block_until_ready(
        reference_forward(x, offset_w, deform_w, deform_b, kH=kH, kW=kW, groups=G))
    max_err = float(jnp.max(jnp.abs(out - ref)))
    # bf16 column / sampled-activation / weight streams (f32 accumulation)
    # compared against an all-f32 reference -> relaxed tolerance.
    if not bool(jnp.allclose(out, ref, atol=1e-1, rtol=1e-1)):
        raise AssertionError(f"Pallas output mismatch vs reference, max_err={max_err}")
    print("KERNEL_OK")
</pallas_src>

<mosaic_0001>
module attributes {stable_mosaic.version = 11 : i64} {
  func.func @_matmul_kernel(%arg0: i32, %arg1: memref<512x72xbf16, #tpu.memory_space<vmem>>, %arg2: memref<72x128xbf16, #tpu.memory_space<vmem>>, %arg3: memref<512x128xf32, #tpu.memory_space<vmem>>) attributes {dimension_semantics = [#tpu.dimension_semantics<parallel>], iteration_bounds = array<i64: 1>, scalar_prefetch = 0 : i64, scratch_operands = 0 : i64, tpu.core_type = #tpu.core_type<tc>, window_params = [{transform_indices = @transform_0, window_bounds = array<i64: 512, 72>}, {pipeline_mode = #tpu.pipeline_mode<synchronous>, transform_indices = @transform_1, window_bounds = array<i64: 72, 128>}, {transform_indices = @transform_2, window_bounds = array<i64: 512, 128>}]} {
    %c0 = arith.constant 0 : index
    %c0_0 = arith.constant 0 : index
    %0 = vector.load %arg1[%c0, %c0_0] : memref<512x72xbf16, #tpu.memory_space<vmem>>, vector<512x72xbf16>
    %c0_1 = arith.constant 0 : index
    %c0_2 = arith.constant 0 : index
    %1 = vector.load %arg2[%c0_1, %c0_2] : memref<72x128xbf16, #tpu.memory_space<vmem>>, vector<72x128xbf16>
    %cst = arith.constant dense<0.000000e+00> : vector<512x128xf32>
    %2 = tpu.matmul %0, %1, %cst {dimension_numbers = #tpu.dot_dimension_numbers<[1], [0], [0], [1], [0, 0, 1, 1], [], []>} : vector<512x72xbf16>, vector<72x128xbf16>, vector<512x128xf32> -> vector<512x128xf32>
    %c0_3 = arith.constant 0 : index
    %c0_4 = arith.constant 0 : index
    %3 = vector.load %arg3[%c0_3, %c0_4] : memref<512x128xf32, #tpu.memory_space<vmem>>, vector<512x128xf32>
    tpu.vector_store %arg3[%c0_3, %c0_4], %2 {strides = array<i32>} : memref<512x128xf32, #tpu.memory_space<vmem>>, vector<512x128xf32>,
    return
  }
  func.func @transform_0(%arg0: i32) -> (i32, i32) {
    %c0_i32 = arith.constant 0 : i32
    %c0_i32_0 = arith.constant 0 : i32
    return %arg0, %c0_i32 : i32, i32
  }
  func.func @transform_1(%arg0: i32) -> (i32, i32) {
    %c0_i32 = arith.constant 0 : i32
    %c0_i32_0 = arith.constant 0 : i32
    %c0_i32_1 = arith.constant 0 : i32
    return %c0_i32, %c0_i32_0 : i32, i32
  }
  func.func @transform_2(%arg0: i32) -> (i32, i32) {
    %c0_i32 = arith.constant 0 : i32
    %c0_i32_0 = arith.constant 0 : i32
    return %arg0, %c0_i32 : i32, i32
  }
}

module attributes {stable_mosaic.version = 11 : i64} {
  func.func @_matmul_bias_kernel(%arg0: i32, %arg1: memref<512x72xbf16, #tpu.memory_space<vmem>>, %arg2: memref<72x128xbf16, #tpu.memory_space<vmem>>, %arg3: memref<1x128xf32, #tpu.memory_space<vmem>>, %arg4: memref<512x128xf32, #tpu.memory_space<vmem>>) attributes {dimension_semantics = [#tpu.dimension_semantics<parallel>], iteration_bounds = array<i64: 1>, scalar_prefetch = 0 : i64, scratch_operands = 0 : i64, tpu.core_type = #tpu.core_type<tc>, window_params = [{transform_indices = @transform_0, window_bounds = array<i64: 512, 72>}, {pipeline_mode = #tpu.pipeline_mode<synchronous>, transform_indices = @transform_1, window_bounds = array<i64: 72, 128>}, {pipeline_mode = #tpu.pipeline_mode<synchronous>, transform_indices = @transform_2, window_bounds = array<i64: 1, 128>}, {transform_indices = @transform_3, window_bounds = array<i64: 512, 128>}]} {
    %c0 = arith.constant 0 : index
    %c0_0 = arith.constant 0 : index
    %0 = vector.load %arg1[%c0, %c0_0] : memref<512x72xbf16, #tpu.memory_space<vmem>>, vector<512x72xbf16>
    %c0_1 = arith.constant 0 : index
    %c0_2 = arith.constant 0 : index
    %1 = vector.load %arg2[%c0_1, %c0_2] : memref<72x128xbf16, #tpu.memory_space<vmem>>, vector<72x128xbf16>
    %cst = arith.constant dense<0.000000e+00> : vector<512x128xf32>
    %2 = tpu.matmul %0, %1, %cst {dimension_numbers = #tpu.dot_dimension_numbers<[1], [0], [0], [1], [0, 0, 1, 1], [], []>} : vector<512x72xbf16>, vector<72x128xbf16>, vector<512x128xf32> -> vector<512x128xf32>
    %c0_3 = arith.constant 0 : index
    %c0_4 = arith.constant 0 : index
    %3 = vector.load %arg3[%c0_3, %c0_4] : memref<1x128xf32, #tpu.memory_space<vmem>>, vector<1x128xf32>
    %4 = vector.broadcast %3 : vector<1x128xf32> to vector<512x128xf32>
    %5 = arith.addf %2, %4 : vector<512x128xf32>
    %c0_5 = arith.constant 0 : index
    %c0_6 = arith.constant 0 : index
    %6 = vector.load %arg4[%c0_5, %c0_6] : memref<512x128xf32, #tpu.memory_space<vmem>>, vector<512x128xf32>
    tpu.vector_store %arg4[%c0_5, %c0_6], %5 {strides = array<i32>} : memref<512x128xf32, #tpu.memory_space<vmem>>, vector<512x128xf32>,
    return
  }
  func.func @transform_0(%arg0: i32) -> (i32, i32) {
    %c0_i32 = arith.constant 0 : i32
    %c0_i32_0 = arith.constant 0 : i32
    return %arg0, %c0_i32 : i32, i32
  }
  func.func @transform_1(%arg0: i32) -> (i32, i32) {
    %c0_i32 = arith.constant 0 : i32
    %c0_i32_0 = arith.constant 0 : i32
    %c0_i32_1 = arith.constant 0 : i32
    return %c0_i32, %c0_i32_0 : i32, i32
  }
  func.func @transform_2(%arg0: i32) -> (i32, i32) {
    %c0_i32 = arith.constant 0 : i32
    %c0_i32_0 = arith.constant 0 : i32
    %c0_i32_1 = arith.constant 0 : i32
    return %c0_i32, %c0_i32_0 : i32, i32
  }
  func.func @transform_3(%arg0: i32) -> (i32, i32) {
    %c0_i32 = arith.constant 0 : i32
    %c0_i32_0 = arith.constant 0 : i32
    return %arg0, %c0_i32 : i32, i32
  }
}

</mosaic_0001>

<bundles_post_ra>
// kernel: deformable_conv_forward.2
= control target key start
LH: loop header
LB: loop body
LE: loop exit
PB: predicated region body
PF: predicated region fallthrough
CT: control target
= control target key end

     0   :  { %vm369_vm0 = vcmask 1043456   ;;  %vm272_vm1 = vcmask 588800   ;;  %s1187_s1 = inlined_call_operand.vmem [shape: bf16[72,128], index: 1, kind: input, shape index: {}]   ;;  %s1188_s0 = inlined_call_operand.vmem [shape: bf16[512,72], index: 0, kind: input, shape index: {}]   ;;  %s1189_s2 = inlined_call_operand.vmem [shape: f32[512,128], index: 2, kind: output, shape index: {}]  }
   0x1   :  { %v84_v0 = vld [vmem:[%s1187_s1 + $0x20] sm:$0xf]  ;;  %v821_v4 = vld [vmem:[%s1187_s1 + $0x18] sm:$0xff]  ;;  %v820_v5 = vld [vmem:[%s1187_s1 + $0x10] sm:$0xff] }
   0x2   :  { %v262_v1 = vunpack.c.l.b16 %v84_v0  ;;  %v819_v6 = vld [vmem:[%s1187_s1 + $0x8] sm:$0xff]  ;;  %v818_v7 = vld [vmem:[%s1187_s1] sm:$0xff]  ;;  %v788_v16 = vld [vmem:[%s1188_s0 + $0x10] sm:$0xff] }
   0x3   :  { %v786_v8 = vld [vmem:[%s1188_s0] sm:$0xff]  ;;  %v787_v12 = vld [vmem:[%s1188_s0 + $0x8] sm:$0xff]  ;;  %v796_v17 = vld [vmem:[%s1188_s0 + $0x50] sm:$0xff] }
   0x4   :  { %v267_v2 = vpack.c.b16 %v262_v1, %v262_v1  ;;  %v794_v9 = vld [vmem:[%s1188_s0 + $0x40] sm:$0xff]  ;;  %v795_v13 = vld [vmem:[%s1188_s0 + $0x48] sm:$0xff]  ;;  %v804_v18 = vld [vmem:[%s1188_s0 + $0x90] sm:$0xff] }
   0x5   :  { %v802_v10 = vld [vmem:[%s1188_s0 + $0x80] sm:$0xff]  ;;  %v803_v14 = vld [vmem:[%s1188_s0 + $0x88] sm:$0xff]  ;;  %v812_v19 = vld [vmem:[%s1188_s0 + $0xd0] sm:$0xff] }
   0x6   :  { %v371_v3 = vsel %vm369_vm0, %v267_v2, 0  ;;  %v810_v11 = vld [vmem:[%s1188_s0 + $0xc0] sm:$0xff]  ;;  %v811_v15 = vld [vmem:[%s1188_s0 + $0xc8] sm:$0xff]  ;;  %v789_v20 = vld [vmem:[%s1188_s0 + $0x18] sm:$0xff] }
   0x7   :  { %376 = vmatpush.bf16.msra.mxu0 %v371_v3  ;;  %822 = vmatpush.bf16.msra.mxu1 %v371_v3  ;;  %v797_v21 = vld [vmem:[%s1188_s0 + $0x58] sm:$0xff]  ;;  %v790_v24 = vld [vmem:[%s1188_s0 + $0x20] sm:$0xff]  ;;  %v791_v28 = vld [vmem:[%s1188_s0 + $0x28] sm:$0xff] }
   0x8   :  { %823 = vmatpush.bf16.msra.mxu2 %v371_v3  ;;  %824 = vmatpush.bf16.msra.mxu3 %v371_v3  ;;  %v805_v22 = vld [vmem:[%s1188_s0 + $0x98] sm:$0xff]  ;;  %v798_v25 = vld [vmem:[%s1188_s0 + $0x60] sm:$0xff]  ;;  %v799_v29 = vld [vmem:[%s1188_s0 + $0x68] sm:$0xff] }
   0x9   :  { %v813_v23 = vld [vmem:[%s1188_s0 + $0xd8] sm:$0xff]  ;;  %v806_v26 = vld [vmem:[%s1188_s0 + $0xa0] sm:$0xff]  ;;  %v807_v30 = vld [vmem:[%s1188_s0 + $0xa8] sm:$0xff] }
   0xa   :  { %v814_v27 = vld [vmem:[%s1188_s0 + $0xe0] sm:$0xff]  ;;  %v815_v31 = vld [vmem:[%s1188_s0 + $0xe8] sm:$0xff]  ;;  %v792_v32 = vld [vmem:[%s1188_s0 + $0x30] sm:$0xff] }
   0xb   :  { %377 = vmatpush.bf16.msra.mxu0 %v821_v4  ;;  %825 = vmatpush.bf16.msra.mxu1 %v821_v4  ;;  %v800_v33 = vld [vmem:[%s1188_s0 + $0x70] sm:$0xff]  ;;  %v793_v36 = vld [vmem:[%s1188_s0 + $0x38] sm:$0xff] }
   0xc   :  { %826 = vmatpush.bf16.msra.mxu2 %v821_v4  ;;  %827 = vmatpush.bf16.msra.mxu3 %v821_v4  ;;  %v808_v34 = vld [vmem:[%s1188_s0 + $0xb0] sm:$0xff]  ;;  %v801_v37 = vld [vmem:[%s1188_s0 + $0x78] sm:$0xff] }
   0xd   :  { %v816_v35 = vld [vmem:[%s1188_s0 + $0xf0] sm:$0xff]  ;;  %v809_v38 = vld [vmem:[%s1188_s0 + $0xb8] sm:$0xff] }
   0xe   :  { %v817_v39 = vld [vmem:[%s1188_s0 + $0xf8] sm:$0xff] }
   0xf   :  { %378 = vmatpush.bf16.msra.mxu0 %v820_v5  ;;  %828 = vmatpush.bf16.msra.mxu1 %v820_v5 }
  0x10   :  { %829 = vmatpush.bf16.msra.mxu2 %v820_v5  ;;  %830 = vmatpush.bf16.msra.mxu3 %v820_v5 }
  0x13   :  { %379 = vmatpush.bf16.msra.mxu0 %v819_v6  ;;  %831 = vmatpush.bf16.msra.mxu1 %v819_v6 }
  0x14   :  { %832 = vmatpush.bf16.msra.mxu2 %v819_v6  ;;  %833 = vmatpush.bf16.msra.mxu3 %v819_v6 }
  0x17   :  { %380 = vmatpush.bf16.msra.mxu0 %v818_v7  ;;  %834 = vmatpush.bf16.msra.mxu1 %v818_v7 }
  0x18   :  { %835 = vmatpush.bf16.msra.mxu2 %v818_v7  ;;  %836 = vmatpush.bf16.msra.mxu3 %v818_v7 }
  0x1a   :  { %754 = vmatmul.msk.bf16.vlgmr.msra.gmra.mxu0 %vm272_vm1, %v786_v8  ;;  %762 = vmatmul.msk.bf16.vlgmr.msra.gmra.mxu1 %vm272_vm1, %v794_v9 }
  0x1b   :  { %770 = vmatmul.msk.bf16.vlgmr.msra.gmra.mxu2 %vm272_vm1, %v802_v10  ;;  %778 = vmatmul.msk.bf16.vlgmr.msra.gmra.mxu3 %vm272_vm1, %v810_v11 }
  0x2a   :  { %755 = vmatmul.msk.bf16.gmra.mxu0 %vm272_vm1, %v787_v12  ;;  %763 = vmatmul.msk.bf16.gmra.mxu1 %vm272_vm1, %v795_v13 }
  0x2b   :  { %771 = vmatmul.msk.bf16.gmra.mxu2 %vm272_vm1, %v803_v14  ;;  %779 = vmatmul.msk.bf16.gmra.mxu3 %vm272_vm1, %v811_v15 }
  0x3a   :  { %756 = vmatmul.msk.bf16.gmra.mxu0 %vm272_vm1, %v788_v16  ;;  %764 = vmatmul.msk.bf16.gmra.mxu1 %vm272_vm1, %v796_v17 }
  0x3b   :  { %772 = vmatmul.msk.bf16.gmra.mxu2 %vm272_vm1, %v804_v18  ;;  %780 = vmatmul.msk.bf16.gmra.mxu3 %vm272_vm1, %v812_v19 }
  0x4a   :  { %757 = vmatmul.msk.bf16.gmra.mxu0 %vm272_vm1, %v789_v20  ;;  %765 = vmatmul.msk.bf16.gmra.mxu1 %vm272_vm1, %v797_v21 }
  0x4b   :  { %773 = vmatmul.msk.bf16.gmra.mxu2 %vm272_vm1, %v805_v22  ;;  %781 = vmatmul.msk.bf16.gmra.mxu3 %vm272_vm1, %v813_v23 }
  0x5a   :  { %758 = vmatmul.msk.bf16.gmra.mxu0 %vm272_vm1, %v790_v24  ;;  %766 = vmatmul.msk.bf16.gmra.mxu1 %vm272_vm1, %v798_v25 }
  0x5b   :  { %774 = vmatmul.msk.bf16.gmra.mxu2 %vm272_vm1, %v806_v26  ;;  %782 = vmatmul.msk.bf16.gmra.mxu3 %vm272_vm1, %v814_v27 }
  0x6a   :  { %759 = vmatmul.msk.bf16.gmra.mxu0 %vm272_vm1, %v791_v28  ;;  %767 = vmatmul.msk.bf16.gmra.mxu1 %vm272_vm1, %v799_v29 }
  0x6b   :  { %775 = vmatmul.msk.bf16.gmra.mxu2 %vm272_vm1, %v807_v30  ;;  %783 = vmatmul.msk.bf16.gmra.mxu3 %vm272_vm1, %v815_v31 }
  0x7a   :  { %760 = vmatmul.msk.bf16.gmra.mxu0 %vm272_vm1, %v792_v32  ;;  %768 = vmatmul.msk.bf16.gmra.mxu1 %vm272_vm1, %v800_v33 }
  0x7b   :  { %776 = vmatmul.msk.bf16.gmra.mxu2 %vm272_vm1, %v808_v34  ;;  %784 = vmatmul.msk.bf16.gmra.mxu3 %vm272_vm1, %v816_v35 }
  0x8a   :  { %761 = vmatmul.msk.bf16.gmra.mxu0 %vm272_vm1, %v793_v36  ;;  %769 = vmatmul.msk.bf16.gmra.mxu1 %vm272_vm1, %v801_v37 }
  0x8b   :  { %777 = vmatmul.msk.bf16.gmra.mxu2 %vm272_vm1, %v809_v38  ;;  %785 = vmatmul.msk.bf16.gmra.mxu3 %vm272_vm1, %v817_v39 }
  0x97   :  { %v382_v40 = vpop.f32.mrf.mxu0  ;;  %v422_v41 = vpop.f32.mrf.mxu1 }
  0x98   :  { %542 = vst [vmem:[%s1189_s2] sm:$0xff] %v382_v40 }
  0x99   :  { %558 = vst [vmem:[%s1189_s2 + $0x80] sm:$0xff] %v422_v41 }
  0x9e   :  { %v462_v42 = vpop.f32.mrf.mxu2  ;;  %v502_v43 = vpop.f32.mrf.mxu3 }
  0x9f   :  { %574 = vst [vmem:[%s1189_s2 + $0x100] sm:$0xff] %v462_v42  ;;  %v384_v44 = vpop.f32.mrf.mxu0  ;;  %v424_v45 = vpop.f32.mrf.mxu1 }
  0xa0   :  { %590 = vst [vmem:[%s1189_s2 + $0x180] sm:$0xff] %v502_v43 }
  0xa1   :  { %543 = vst [vmem:[%s1189_s2 + $0x8] sm:$0xff] %v384_v44 }
  0xa2   :  { %559 = vst [vmem:[%s1189_s2 + $0x88] sm:$0xff] %v424_v45 }
  0xa6   :  { %v464_v46 = vpop.f32.mrf.mxu2  ;;  %v504_v47 = vpop.f32.mrf.mxu3 }
  0xa7   :  { %575 = vst [vmem:[%s1189_s2 + $0x108] sm:$0xff] %v464_v46  ;;  %v387_v48 = vpop.f32.mrf.mxu0  ;;  %v427_v49 = vpop.f32.mrf.mxu1 }
  0xa8   :  { %591 = vst [vmem:[%s1189_s2 + $0x188] sm:$0xff] %v504_v47 }
  0xa9   :  { %544 = vst [vmem:[%s1189_s2 + $0x10] sm:$0xff] %v387_v48 }
  0xaa   :  { %560 = vst [vmem:[%s1189_s2 + $0x90] sm:$0xff] %v427_v49 }
  0xae   :  { %v467_v50 = vpop.f32.mrf.mxu2  ;;  %v507_v51 = vpop.f32.mrf.mxu3 }
  0xaf   :  { %576 = vst [vmem:[%s1189_s2 + $0x110] sm:$0xff] %v467_v50  ;;  %v389_v52 = vpop.f32.mrf.mxu0  ;;  %v429_v53 = vpop.f32.mrf.mxu1 }
  0xb0   :  { %592 = vst [vmem:[%s1189_s2 + $0x190] sm:$0xff] %v507_v51 }
  0xb1   :  { %545 = vst [vmem:[%s1189_s2 + $0x18] sm:$0xff] %v389_v52 }
  0xb2   :  { %561 = vst [vmem:[%s1189_s2 + $0x98] sm:$0xff] %v429_v53 }
  0xb6   :  { %v469_v54 = vpop.f32.mrf.mxu2  ;;  %v509_v55 = vpop.f32.mrf.mxu3 }
  0xb7   :  { %577 = vst [vmem:[%s1189_s2 + $0x118] sm:$0xff] %v469_v54  ;;  %v392_v56 = vpop.f32.mrf.mxu0  ;;  %v432_v57 = vpop.f32.mrf.mxu1 }
  0xb8   :  { %593 = vst [vmem:[%s1189_s2 + $0x198] sm:$0xff] %v509_v55 }
  0xb9   :  { %546 = vst [vmem:[%s1189_s2 + $0x20] sm:$0xff] %v392_v56 }
  0xba   :  { %562 = vst [vmem:[%s1189_s2 + $0xa0] sm:$0xff] %v432_v57 }
  0xbe   :  { %v472_v58 = vpop.f32.mrf.mxu2  ;;  %v512_v59 = vpop.f32.mrf.mxu3 }
  0xbf   :  { %578 = vst [vmem:[%s1189_s2 + $0x120] sm:$0xff] %v472_v58  ;;  %v394_v60 = vpop.f32.mrf.mxu0  ;;  %v434_v61 = vpop.f32.mrf.mxu1 }
  0xc0   :  { %594 = vst [vmem:[%s1189_s2 + $0x1a0] sm:$0xff] %v512_v59 }
  0xc1   :  { %547 = vst [vmem:[%s1189_s2 + $0x28] sm:$0xff] %v394_v60 }
  0xc2   :  { %563 = vst [vmem:[%s1189_s2 + $0xa8] sm:$0xff] %v434_v61 }
  0xc6   :  { %v474_v62 = vpop.f32.mrf.mxu2  ;;  %v514_v63 = vpop.f32.mrf.mxu3 }
  0xc7   :  { %579 = vst [vmem:[%s1189_s2 + $0x128] sm:$0xff] %v474_v62  ;;  %v397_v0 = vpop.f32.mrf.mxu0  ;;  %v437_v1 = vpop.f32.mrf.mxu1 }
  0xc8   :  { %595 = vst [vmem:[%s1189_s2 + $0x1a8] sm:$0xff] %v514_v63 }
  0xc9   :  { %548 = vst [vmem:[%s1189_s2 + $0x30] sm:$0xff] %v397_v0 }
  0xca   :  { %564 = vst [vmem:[%s1189_s2 + $0xb0] sm:$0xff] %v437_v1 }
  0xce   :  { %v477_v2 = vpop.f32.mrf.mxu2  ;;  %v517_v3 = vpop.f32.mrf.mxu3 }
  0xcf   :  { %580 = vst [vmem:[%s1189_s2 + $0x130] sm:$0xff] %v477_v2  ;;  %v399_v4 = vpop.f32.mrf.mxu0  ;;  %v439_v5 = vpop.f32.mrf.mxu1 }
  0xd0   :  { %596 = vst [vmem:[%s1189_s2 + $0x1b0] sm:$0xff] %v517_v3 }
  0xd1   :  { %549 = vst [vmem:[%s1189_s2 + $0x38] sm:$0xff] %v399_v4 }
  0xd2   :  { %565 = vst [vmem:[%s1189_s2 + $0xb8] sm:$0xff] %v439_v5 }
  0xd6   :  { %v479_v6 = vpop.f32.mrf.mxu2  ;;  %v519_v7 = vpop.f32.mrf.mxu3 }
  0xd7   :  { %581 = vst [vmem:[%s1189_s2 + $0x138] sm:$0xff] %v479_v6  ;;  %v402_v8 = vpop.f32.mrf.mxu0  ;;  %v442_v9 = vpop.f32.mrf.mxu1 }
  0xd8   :  { %597 = vst [vmem:[%s1189_s2 + $0x1b8] sm:$0xff] %v519_v7 }
  0xd9   :  { %550 = vst [vmem:[%s1189_s2 + $0x40] sm:$0xff] %v402_v8 }
  0xda   :  { %566 = vst [vmem:[%s1189_s2 + $0xc0] sm:$0xff] %v442_v9 }
  0xde   :  { %v482_v10 = vpop.f32.mrf.mxu2  ;;  %v522_v11 = vpop.f32.mrf.mxu3 }
  0xdf   :  { %582 = vst [vmem:[%s1189_s2 + $0x140] sm:$0xff] %v482_v10  ;;  %v404_v12 = vpop.f32.mrf.mxu0  ;;  %v444_v13 = vpop.f32.mrf.mxu1 }
  0xe0   :  { %598 = vst [vmem:[%s1189_s2 + $0x1c0] sm:$0xff] %v522_v11 }
  0xe1   :  { %551 = vst [vmem:[%s1189_s2 + $0x48] sm:$0xff] %v404_v12 }
  0xe2   :  { %567 = vst [vmem:[%s1189_s2 + $0xc8] sm:$0xff] %v444_v13 }
  0xe6   :  { %v484_v14 = vpop.f32.mrf.mxu2  ;;  %v524_v15 = vpop.f32.mrf.mxu3 }
  0xe7   :  { %583 = vst [vmem:[%s1189_s2 + $0x148] sm:$0xff] %v484_v14  ;;  %v407_v16 = vpop.f32.mrf.mxu0  ;;  %v447_v17 = vpop.f32.mrf.mxu1 }
  0xe8   :  { %599 = vst [vmem:[%s1189_s2 + $0x1c8] sm:$0xff] %v524_v15 }
  0xe9   :  { %552 = vst [vmem:[%s1189_s2 + $0x50] sm:$0xff] %v407_v16 }
  0xea   :  { %568 = vst [vmem:[%s1189_s2 + $0xd0] sm:$0xff] %v447_v17 }
  0xee   :  { %v487_v18 = vpop.f32.mrf.mxu2  ;;  %v527_v19 = vpop.f32.mrf.mxu3 }
  0xef   :  { %584 = vst [vmem:[%s1189_s2 + $0x150] sm:$0xff] %v487_v18  ;;  %v409_v20 = vpop.f32.mrf.mxu0  ;;  %v449_v21 = vpop.f32.mrf.mxu1 }
  0xf0   :  { %600 = vst [vmem:[%s1189_s2 + $0x1d0] sm:$0xff] %v527_v19 }
  0xf1   :  { %553 = vst [vmem:[%s1189_s2 + $0x58] sm:$0xff] %v409_v20 }
  0xf2   :  { %569 = vst [vmem:[%s1189_s2 + $0xd8] sm:$0xff] %v449_v21 }
  0xf6   :  { %v489_v22 = vpop.f32.mrf.mxu2  ;;  %v529_v23 = vpop.f32.mrf.mxu3 }
  0xf7   :  { %585 = vst [vmem:[%s1189_s2 + $0x158] sm:$0xff] %v489_v22  ;;  %v412_v24 = vpop.f32.mrf.mxu0  ;;  %v452_v25 = vpop.f32.mrf.mxu1 }
  0xf8   :  { %601 = vst [vmem:[%s1189_s2 + $0x1d8] sm:$0xff] %v529_v23 }
  0xf9   :  { %554 = vst [vmem:[%s1189_s2 + $0x60] sm:$0xff] %v412_v24 }
  0xfa   :  { %570 = vst [vmem:[%s1189_s2 + $0xe0] sm:$0xff] %v452_v25 }
  0xfe   :  { %v492_v26 = vpop.f32.mrf.mxu2  ;;  %v532_v27 = vpop.f32.mrf.mxu3 }
  0xff   :  { %586 = vst [vmem:[%s1189_s2 + $0x160] sm:$0xff] %v492_v26  ;;  %v414_v28 = vpop.f32.mrf.mxu0  ;;  %v454_v29 = vpop.f32.mrf.mxu1 }
 0x100   :  { %602 = vst [vmem:[%s1189_s2 + $0x1e0] sm:$0xff] %v532_v27 }
 0x101   :  { %555 = vst [vmem:[%s1189_s2 + $0x68] sm:$0xff] %v414_v28 }
 0x102   :  { %571 = vst [vmem:[%s1189_s2 + $0xe8] sm:$0xff] %v454_v29 }
 0x106   :  { %v494_v30 = vpop.f32.mrf.mxu2  ;;  %v534_v31 = vpop.f32.mrf.mxu3 }
 0x107   :  { %587 = vst [vmem:[%s1189_s2 + $0x168] sm:$0xff] %v494_v30  ;;  %v417_v32 = vpop.f32.mrf.mxu0  ;;  %v457_v33 = vpop.f32.mrf.mxu1 }
 0x108   :  { %603 = vst [vmem:[%s1189_s2 + $0x1e8] sm:$0xff] %v534_v31 }
 0x109   :  { %556 = vst [vmem:[%s1189_s2 + $0x70] sm:$0xff] %v417_v32 }
 0x10a   :  { %572 = vst [vmem:[%s1189_s2 + $0xf0] sm:$0xff] %v457_v33 }
 0x10e   :  { %v497_v34 = vpop.f32.mrf.mxu2  ;;  %v537_v35 = vpop.f32.mrf.mxu3 }
 0x10f   :  { %588 = vst [vmem:[%s1189_s2 + $0x170] sm:$0xff] %v497_v34  ;;  %v419_v36 = vpop.f32.mrf.mxu0  ;;  %v459_v37 = vpop.f32.mrf.mxu1 }
 0x110   :  { %604 = vst [vmem:[%s1189_s2 + $0x1f0] sm:$0xff] %v537_v35 }
 0x111   :  { %557 = vst [vmem:[%s1189_s2 + $0x78] sm:$0xff] %v419_v36 }
 0x112   :  { %573 = vst [vmem:[%s1189_s2 + $0xf8] sm:$0xff] %v459_v37 }
 0x116   :  { %v499_v38 = vpop.f32.mrf.mxu2  ;;  %v539_v39 = vpop.f32.mrf.mxu3 }
 0x117   :  { %589 = vst [vmem:[%s1189_s2 + $0x178] sm:$0xff] %v499_v38 }
 0x118   :  { %605 = vst [vmem:[%s1189_s2 + $0x1f8] sm:$0xff] %v539_v39 }

// kernel: deformable_conv_forward.3
= control target key start
LH: loop header
LB: loop body
LE: loop exit
PB: predicated region body
PF: predicated region fallthrough
CT: control target
= control target key end

     0   :  { %vm376_vm0 = vcmask 1043456   ;;  %vm279_vm1 = vcmask 588800   ;;  %s1269_s1 = inlined_call_operand.vmem [shape: bf16[72,128], index: 1, kind: input, shape index: {}]   ;;  %s1270_s2 = inlined_call_operand.vmem [shape: f32[1,128], index: 2, kind: input, shape index: {}]   ;;  %s1271_s0 = inlined_call_operand.vmem [shape: bf16[512,72], index: 0, kind: input, shape index: {}]   ;;  %s1272_s3 = inlined_call_operand.vmem [shape: f32[512,128], index: 3, kind: output, shape index: {}]  }
   0x1   :  { %v87_v0 = vld [vmem:[%s1269_s1 + $0x20] sm:$0xf]  ;;  %v828_v4 = vld [vmem:[%s1269_s1 + $0x18] sm:$0xff]  ;;  %v827_v5 = vld [vmem:[%s1269_s1 + $0x10] sm:$0xff] }
   0x2   :  { %v269_v1 = vunpack.c.l.b16 %v87_v0  ;;  %v826_v6 = vld [vmem:[%s1269_s1 + $0x8] sm:$0xff]  ;;  %v825_v7 = vld [vmem:[%s1269_s1] sm:$0xff]  ;;  %v795_v16 = vld [vmem:[%s1271_s0 + $0x10] sm:$0xff] }
   0x3   :  { %v793_v8 = vld [vmem:[%s1271_s0] sm:$0xff]  ;;  %v794_v12 = vld [vmem:[%s1271_s0 + $0x8] sm:$0xff]  ;;  %v803_v17 = vld [vmem:[%s1271_s0 + $0x50] sm:$0xff] }
   0x4   :  { %v274_v2 = vpack.c.b16 %v269_v1, %v269_v1  ;;  %v801_v9 = vld [vmem:[%s1271_s0 + $0x40] sm:$0xff]  ;;  %v802_v13 = vld [vmem:[%s1271_s0 + $0x48] sm:$0xff]  ;;  %v811_v18 = vld [vmem:[%s1271_s0 + $0x90] sm:$0xff] }
   0x5   :  { %v809_v10 = vld [vmem:[%s1271_s0 + $0x80] sm:$0xff]  ;;  %v810_v14 = vld [vmem:[%s1271_s0 + $0x88] sm:$0xff]  ;;  %v819_v19 = vld [vmem:[%s1271_s0 + $0xd0] sm:$0xff] }
   0x6   :  { %v378_v3 = vsel %vm376_vm0, %v274_v2, 0  ;;  %v817_v11 = vld [vmem:[%s1271_s0 + $0xc0] sm:$0xff]  ;;  %v818_v15 = vld [vmem:[%s1271_s0 + $0xc8] sm:$0xff]  ;;  %v796_v20 = vld [vmem:[%s1271_s0 + $0x18] sm:$0xff] }
   0x7   :  { %383 = vmatpush.bf16.msra.mxu0 %v378_v3  ;;  %829 = vmatpush.bf16.msra.mxu1 %v378_v3  ;;  %v804_v21 = vld [vmem:[%s1271_s0 + $0x58] sm:$0xff]  ;;  %v797_v24 = vld [vmem:[%s1271_s0 + $0x20] sm:$0xff]  ;;  %v798_v28 = vld [vmem:[%s1271_s0 + $0x28] sm:$0xff] }
   0x8   :  { %830 = vmatpush.bf16.msra.mxu2 %v378_v3  ;;  %831 = vmatpush.bf16.msra.mxu3 %v378_v3  ;;  %v812_v22 = vld [vmem:[%s1271_s0 + $0x98] sm:$0xff]  ;;  %v805_v25 = vld [vmem:[%s1271_s0 + $0x60] sm:$0xff]  ;;  %v806_v29 = vld [vmem:[%s1271_s0 + $0x68] sm:$0xff] }
   0x9   :  { %v820_v23 = vld [vmem:[%s1271_s0 + $0xd8] sm:$0xff]  ;;  %v813_v26 = vld [vmem:[%s1271_s0 + $0xa0] sm:$0xff]  ;;  %v814_v30 = vld [vmem:[%s1271_s0 + $0xa8] sm:$0xff] }
   0xa   :  { %v821_v27 = vld [vmem:[%s1271_s0 + $0xe0] sm:$0xff]  ;;  %v822_v31 = vld [vmem:[%s1271_s0 + $0xe8] sm:$0xff]  ;;  %v799_v32 = vld [vmem:[%s1271_s0 + $0x30] sm:$0xff] }
   0xb   :  { %384 = vmatpush.bf16.msra.mxu0 %v828_v4  ;;  %832 = vmatpush.bf16.msra.mxu1 %v828_v4  ;;  %v807_v33 = vld [vmem:[%s1271_s0 + $0x70] sm:$0xff]  ;;  %v800_v36 = vld [vmem:[%s1271_s0 + $0x38] sm:$0xff]  ;;  %v1011_v40 = vld [vmem:[%s1270_s2] ss:$0 sm:$0xff] }
   0xc   :  { %833 = vmatpush.bf16.msra.mxu2 %v828_v4  ;;  %834 = vmatpush.bf16.msra.mxu3 %v828_v4  ;;  %v815_v34 = vld [vmem:[%s1271_s0 + $0xb0] sm:$0xff]  ;;  %v808_v37 = vld [vmem:[%s1271_s0 + $0x78] sm:$0xff] }
   0xd   :  { %v823_v35 = vld [vmem:[%s1271_s0 + $0xf0] sm:$0xff]  ;;  %v816_v38 = vld [vmem:[%s1271_s0 + $0xb8] sm:$0xff] }
   0xe   :  { %v824_v39 = vld [vmem:[%s1271_s0 + $0xf8] sm:$0xff] }
   0xf   :  { %385 = vmatpush.bf16.msra.mxu0 %v827_v5  ;;  %835 = vmatpush.bf16.msra.mxu1 %v827_v5 }
  0x10   :  { %836 = vmatpush.bf16.msra.mxu2 %v827_v5  ;;  %837 = vmatpush.bf16.msra.mxu3 %v827_v5 }
  0x13   :  { %386 = vmatpush.bf16.msra.mxu0 %v826_v6  ;;  %838 = vmatpush.bf16.msra.mxu1 %v826_v6 }
  0x14   :  { %839 = vmatpush.bf16.msra.mxu2 %v826_v6  ;;  %840 = vmatpush.bf16.msra.mxu3 %v826_v6 }
  0x17   :  { %387 = vmatpush.bf16.msra.mxu0 %v825_v7  ;;  %841 = vmatpush.bf16.msra.mxu1 %v825_v7 }
  0x18   :  { %842 = vmatpush.bf16.msra.mxu2 %v825_v7  ;;  %843 = vmatpush.bf16.msra.mxu3 %v825_v7 }
  0x1a   :  { %761 = vmatmul.msk.bf16.vlgmr.msra.gmra.mxu0 %vm279_vm1, %v793_v8  ;;  %769 = vmatmul.msk.bf16.vlgmr.msra.gmra.mxu1 %vm279_vm1, %v801_v9 }
  0x1b   :  { %777 = vmatmul.msk.bf16.vlgmr.msra.gmra.mxu2 %vm279_vm1, %v809_v10  ;;  %785 = vmatmul.msk.bf16.vlgmr.msra.gmra.mxu3 %vm279_vm1, %v817_v11 }
  0x2a   :  { %762 = vmatmul.msk.bf16.gmra.mxu0 %vm279_vm1, %v794_v12  ;;  %770 = vmatmul.msk.bf16.gmra.mxu1 %vm279_vm1, %v802_v13 }
  0x2b   :  { %778 = vmatmul.msk.bf16.gmra.mxu2 %vm279_vm1, %v810_v14  ;;  %786 = vmatmul.msk.bf16.gmra.mxu3 %vm279_vm1, %v818_v15 }
  0x3a   :  { %763 = vmatmul.msk.bf16.gmra.mxu0 %vm279_vm1, %v795_v16  ;;  %771 = vmatmul.msk.bf16.gmra.mxu1 %vm279_vm1, %v803_v17 }
  0x3b   :  { %779 = vmatmul.msk.bf16.gmra.mxu2 %vm279_vm1, %v811_v18  ;;  %787 = vmatmul.msk.bf16.gmra.mxu3 %vm279_vm1, %v819_v19 }
  0x4a   :  { %764 = vmatmul.msk.bf16.gmra.mxu0 %vm279_vm1, %v796_v20  ;;  %772 = vmatmul.msk.bf16.gmra.mxu1 %vm279_vm1, %v804_v21 }
  0x4b   :  { %780 = vmatmul.msk.bf16.gmra.mxu2 %vm279_vm1, %v812_v22  ;;  %788 = vmatmul.msk.bf16.gmra.mxu3 %vm279_vm1, %v820_v23 }
  0x5a   :  { %765 = vmatmul.msk.bf16.gmra.mxu0 %vm279_vm1, %v797_v24  ;;  %773 = vmatmul.msk.bf16.gmra.mxu1 %vm279_vm1, %v805_v25 }
  0x5b   :  { %781 = vmatmul.msk.bf16.gmra.mxu2 %vm279_vm1, %v813_v26  ;;  %789 = vmatmul.msk.bf16.gmra.mxu3 %vm279_vm1, %v821_v27 }
  0x6a   :  { %766 = vmatmul.msk.bf16.gmra.mxu0 %vm279_vm1, %v798_v28  ;;  %774 = vmatmul.msk.bf16.gmra.mxu1 %vm279_vm1, %v806_v29 }
  0x6b   :  { %782 = vmatmul.msk.bf16.gmra.mxu2 %vm279_vm1, %v814_v30  ;;  %790 = vmatmul.msk.bf16.gmra.mxu3 %vm279_vm1, %v822_v31 }
  0x7a   :  { %767 = vmatmul.msk.bf16.gmra.mxu0 %vm279_vm1, %v799_v32  ;;  %775 = vmatmul.msk.bf16.gmra.mxu1 %vm279_vm1, %v807_v33 }
  0x7b   :  { %783 = vmatmul.msk.bf16.gmra.mxu2 %vm279_vm1, %v815_v34  ;;  %791 = vmatmul.msk.bf16.gmra.mxu3 %vm279_vm1, %v823_v35 }
  0x8a   :  { %768 = vmatmul.msk.bf16.gmra.mxu0 %vm279_vm1, %v800_v36  ;;  %776 = vmatmul.msk.bf16.gmra.mxu1 %vm279_vm1, %v808_v37 }
  0x8b   :  { %784 = vmatmul.msk.bf16.gmra.mxu2 %vm279_vm1, %v816_v38  ;;  %792 = vmatmul.msk.bf16.gmra.mxu3 %vm279_vm1, %v824_v39 }
  0x97   :  { %v389_v41 = vpop.f32.mrf.mxu0  ;;  %v429_v42 = vpop.f32.mrf.mxu1 }
  0x98   :  { %v390_v43 = vadd.f32 %v1011_v40, %v389_v41  ;;  %v430_v44 = vadd.f32 %v1011_v40, %v429_v42 }
  0x9a   :  { %549 = vst [vmem:[%s1272_s3] sm:$0xff] %v390_v43 }
  0x9b   :  { %565 = vst [vmem:[%s1272_s3 + $0x80] sm:$0xff] %v430_v44 }
  0x9e   :  { %v469_v45 = vpop.f32.mrf.mxu2  ;;  %v509_v46 = vpop.f32.mrf.mxu3 }
  0x9f   :  { %v470_v47 = vadd.f32 %v1011_v40, %v469_v45  ;;  %v510_v48 = vadd.f32 %v1011_v40, %v509_v46  ;;  %v391_v49 = vpop.f32.mrf.mxu0  ;;  %v431_v50 = vpop.f32.mrf.mxu1 }
  0xa0   :  { %v392_v51 = vadd.f32 %v1011_v40, %v391_v49  ;;  %v432_v52 = vadd.f32 %v1011_v40, %v431_v50 }
  0xa1   :  { %581 = vst [vmem:[%s1272_s3 + $0x100] sm:$0xff] %v470_v47 }
  0xa2   :  { %597 = vst [vmem:[%s1272_s3 + $0x180] sm:$0xff] %v510_v48 }
  0xa3   :  { %550 = vst [vmem:[%s1272_s3 + $0x8] sm:$0xff] %v392_v51 }
  0xa4   :  { %566 = vst [vmem:[%s1272_s3 + $0x88] sm:$0xff] %v432_v52 }
  0xa6   :  { %v471_v53 = vpop.f32.mrf.mxu2  ;;  %v511_v54 = vpop.f32.mrf.mxu3 }
  0xa7   :  { %v472_v55 = vadd.f32 %v1011_v40, %v471_v53  ;;  %v512_v56 = vadd.f32 %v1011_v40, %v511_v54  ;;  %v394_v57 = vpop.f32.mrf.mxu0  ;;  %v434_v58 = vpop.f32.mrf.mxu1 }
  0xa8   :  { %v395_v59 = vadd.f32 %v1011_v40, %v394_v57  ;;  %v435_v60 = vadd.f32 %v1011_v40, %v434_v58 }
  0xa9   :  { %582 = vst [vmem:[%s1272_s3 + $0x108] sm:$0xff] %v472_v55 }
  0xaa   :  { %598 = vst [vmem:[%s1272_s3 + $0x188] sm:$0xff] %v512_v56 }
  0xab   :  { %551 = vst [vmem:[%s1272_s3 + $0x10] sm:$0xff] %v395_v59 }
  0xac   :  { %567 = vst [vmem:[%s1272_s3 + $0x90] sm:$0xff] %v435_v60 }
  0xae   :  { %v474_v61 = vpop.f32.mrf.mxu2  ;;  %v514_v62 = vpop.f32.mrf.mxu3 }
  0xaf   :  { %v475_v63 = vadd.f32 %v1011_v40, %v474_v61  ;;  %v515_v0 = vadd.f32 %v1011_v40, %v514_v62  ;;  %v396_v1 = vpop.f32.mrf.mxu0  ;;  %v436_v2 = vpop.f32.mrf.mxu1 }
  0xb0   :  { %v397_v3 = vadd.f32 %v1011_v40, %v396_v1  ;;  %v437_v4 = vadd.f32 %v1011_v40, %v436_v2 }
  0xb1   :  { %583 = vst [vmem:[%s1272_s3 + $0x110] sm:$0xff] %v475_v63 }
  0xb2   :  { %599 = vst [vmem:[%s1272_s3 + $0x190] sm:$0xff] %v515_v0 }
  0xb3   :  { %552 = vst [vmem:[%s1272_s3 + $0x18] sm:$0xff] %v397_v3 }
  0xb4   :  { %568 = vst [vmem:[%s1272_s3 + $0x98] sm:$0xff] %v437_v4 }
  0xb6   :  { %v476_v5 = vpop.f32.mrf.mxu2  ;;  %v516_v6 = vpop.f32.mrf.mxu3 }
  0xb7   :  { %v477_v7 = vadd.f32 %v1011_v40, %v476_v5  ;;  %v517_v8 = vadd.f32 %v1011_v40, %v516_v6  ;;  %v399_v9 = vpop.f32.mrf.mxu0  ;;  %v439_v10 = vpop.f32.mrf.mxu1 }
  0xb8   :  { %v400_v11 = vadd.f32 %v1011_v40, %v399_v9  ;;  %v440_v12 = vadd.f32 %v1011_v40, %v439_v10 }
  0xb9   :  { %584 = vst [vmem:[%s1272_s3 + $0x118] sm:$0xff] %v477_v7 }
  0xba   :  { %600 = vst [vmem:[%s1272_s3 + $0x198] sm:$0xff] %v517_v8 }
  0xbb   :  { %553 = vst [vmem:[%s1272_s3 + $0x20] sm:$0xff] %v400_v11 }
  0xbc   :  { %569 = vst [vmem:[%s1272_s3 + $0xa0] sm:$0xff] %v440_v12 }
  0xbe   :  { %v479_v13 = vpop.f32.mrf.mxu2  ;;  %v519_v14 = vpop.f32.mrf.mxu3 }
  0xbf   :  { %v480_v15 = vadd.f32 %v1011_v40, %v479_v13  ;;  %v520_v16 = vadd.f32 %v1011_v40, %v519_v14  ;;  %v401_v17 = vpop.f32.mrf.mxu0  ;;  %v441_v18 = vpop.f32.mrf.mxu1 }
  0xc0   :  { %v402_v19 = vadd.f32 %v1011_v40, %v401_v17  ;;  %v442_v20 = vadd.f32 %v1011_v40, %v441_v18 }
  0xc1   :  { %585 = vst [vmem:[%s1272_s3 + $0x120] sm:$0xff] %v480_v15 }
  0xc2   :  { %601 = vst [vmem:[%s1272_s3 + $0x1a0] sm:$0xff] %v520_v16 }
  0xc3   :  { %554 = vst [vmem:[%s1272_s3 + $0x28] sm:$0xff] %v402_v19 }
  0xc4   :  { %570 = vst [vmem:[%s1272_s3 + $0xa8] sm:$0xff] %v442_v20 }
  0xc6   :  { %v481_v21 = vpop.f32.mrf.mxu2  ;;  %v521_v22 = vpop.f32.mrf.mxu3 }
  0xc7   :  { %v482_v23 = vadd.f32 %v1011_v40, %v481_v21  ;;  %v522_v24 = vadd.f32 %v1011_v40, %v521_v22  ;;  %v404_v25 = vpop.f32.mrf.mxu0  ;;  %v444_v26 = vpop.f32.mrf.mxu1 }
  0xc8   :  { %v405_v27 = vadd.f32 %v1011_v40, %v404_v25  ;;  %v445_v28 = vadd.f32 %v1011_v40, %v444_v26 }
  0xc9   :  { %586 = vst [vmem:[%s1272_s3 + $0x128] sm:$0xff] %v482_v23 }
  0xca   :  { %602 = vst [vmem:[%s1272_s3 + $0x1a8] sm:$0xff] %v522_v24 }
  0xcb   :  { %555 = vst [vmem:[%s1272_s3 + $0x30] sm:$0xff] %v405_v27 }
  0xcc   :  { %571 = vst [vmem:[%s1272_s3 + $0xb0] sm:$0xff] %v445_v28 }
  0xce   :  { %v484_v29 = vpop.f32.mrf.mxu2  ;;  %v524_v30 = vpop.f32.mrf.mxu3 }
  0xcf   :  { %v485_v31 = vadd.f32 %v1011_v40, %v484_v29  ;;  %v525_v32 = vadd.f32 %v1011_v40, %v524_v30  ;;  %v406_v33 = vpop.f32.mrf.mxu0  ;;  %v446_v34 = vpop.f32.mrf.mxu1 }
  0xd0   :  { %v407_v35 = vadd.f32 %v1011_v40, %v406_v33  ;;  %v447_v36 = vadd.f32 %v1011_v40, %v446_v34 }
  0xd1   :  { %587 = vst [vmem:[%s1272_s3 + $0x130] sm:$0xff] %v485_v31 }
  0xd2   :  { %603 = vst [vmem:[%s1272_s3 + $0x1b0] sm:$0xff] %v525_v32 }
  0xd3   :  { %556 = vst [vmem:[%s1272_s3 + $0x38] sm:$0xff] %v407_v35 }
  0xd4   :  { %572 = vst [vmem:[%s1272_s3 + $0xb8] sm:$0xff] %v447_v36 }
  0xd6   :  { %v486_v37 = vpop.f32.mrf.mxu2  ;;  %v526_v38 = vpop.f32.mrf.mxu3 }
  0xd7   :  { %v487_v39 = vadd.f32 %v1011_v40, %v486_v37  ;;  %v527_v41 = vadd.f32 %v1011_v40, %v526_v38  ;;  %v409_v42 = vpop.f32.mrf.mxu0  ;;  %v449_v43 = vpop.f32.mrf.mxu1 }
  0xd8   :  { %v410_v44 = vadd.f32 %v1011_v40, %v409_v42  ;;  %v450_v45 = vadd.f32 %v1011_v40, %v449_v43 }
  0xd9   :  { %588 = vst [vmem:[%s1272_s3 + $0x138] sm:$0xff] %v487_v39 }
  0xda   :  { %604 = vst [vmem:[%s1272_s3 + $0x1b8] sm:$0xff] %v527_v41 }
  0xdb   :  { %557 = vst [vmem:[%s1272_s3 + $0x40] sm:$0xff] %v410_v44 }
  0xdc   :  { %573 = vst [vmem:[%s1272_s3 + $0xc0] sm:$0xff] %v450_v45 }
  0xde   :  { %v489_v46 = vpop.f32.mrf.mxu2  ;;  %v529_v47 = vpop.f32.mrf.mxu3 }
  0xdf   :  { %v490_v48 = vadd.f32 %v1011_v40, %v489_v46  ;;  %v530_v49 = vadd.f32 %v1011_v40, %v529_v47  ;;  %v411_v50 = vpop.f32.mrf.mxu0  ;;  %v451_v51 = vpop.f32.mrf.mxu1 }
  0xe0   :  { %v412_v52 = vadd.f32 %v1011_v40, %v411_v50  ;;  %v452_v53 = vadd.f32 %v1011_v40, %v451_v51 }
  0xe1   :  { %589 = vst [vmem:[%s1272_s3 + $0x140] sm:$0xff] %v490_v48 }
  0xe2   :  { %605 = vst [vmem:[%s1272_s3 + $0x1c0] sm:$0xff] %v530_v49 }
  0xe3   :  { %558 = vst [vmem:[%s1272_s3 + $0x48] sm:$0xff] %v412_v52 }
  0xe4   :  { %574 = vst [vmem:[%s1272_s3 + $0xc8] sm:$0xff] %v452_v53 }
  0xe6   :  { %v491_v54 = vpop.f32.mrf.mxu2  ;;  %v531_v55 = vpop.f32.mrf.mxu3 }
  0xe7   :  { %v492_v56 = vadd.f32 %v1011_v40, %v491_v54  ;;  %v532_v57 = vadd.f32 %v1011_v40, %v531_v55  ;;  %v414_v58 = vpop.f32.mrf.mxu0  ;;  %v454_v59 = vpop.f32.mrf.mxu1 }
  0xe8   :  { %v415_v60 = vadd.f32 %v1011_v40, %v414_v58  ;;  %v455_v61 = vadd.f32 %v1011_v40, %v454_v59 }
  0xe9   :  { %590 = vst [vmem:[%s1272_s3 + $0x148] sm:$0xff] %v492_v56 }
  0xea   :  { %606 = vst [vmem:[%s1272_s3 + $0x1c8] sm:$0xff] %v532_v57 }
  0xeb   :  { %559 = vst [vmem:[%s1272_s3 + $0x50] sm:$0xff] %v415_v60 }
  0xec   :  { %575 = vst [vmem:[%s1272_s3 + $0xd0] sm:$0xff] %v455_v61 }
  0xee   :  { %v494_v62 = vpop.f32.mrf.mxu2  ;;  %v534_v63 = vpop.f32.mrf.mxu3 }
  0xef   :  { %v495_v0 = vadd.f32 %v1011_v40, %v494_v62  ;;  %v535_v1 = vadd.f32 %v1011_v40, %v534_v63  ;;  %v416_v2 = vpop.f32.mrf.mxu0  ;;  %v456_v3 = vpop.f32.mrf.mxu1 }
  0xf0   :  { %v417_v4 = vadd.f32 %v1011_v40, %v416_v2  ;;  %v457_v5 = vadd.f32 %v1011_v40, %v456_v3 }
  0xf1   :  { %591 = vst [vmem:[%s1272_s3 + $0x150] sm:$0xff] %v495_v0 }
  0xf2   :  { %607 = vst [vmem:[%s1272_s3 + $0x1d0] sm:$0xff] %v535_v1 }
  0xf3   :  { %560 = vst [vmem:[%s1272_s3 + $0x58] sm:$0xff] %v417_v4 }
  0xf4   :  { %576 = vst [vmem:[%s1272_s3 + $0xd8] sm:$0xff] %v457_v5 }
  0xf6   :  { %v496_v6 = vpop.f32.mrf.mxu2  ;;  %v536_v7 = vpop.f32.mrf.mxu3 }
  0xf7   :  { %v497_v8 = vadd.f32 %v1011_v40, %v496_v6  ;;  %v537_v9 = vadd.f32 %v1011_v40, %v536_v7  ;;  %v419_v10 = vpop.f32.mrf.mxu0  ;;  %v459_v11 = vpop.f32.mrf.mxu1 }
  0xf8   :  { %v420_v12 = vadd.f32 %v1011_v40, %v419_v10  ;;  %v460_v13 = vadd.f32 %v1011_v40, %v459_v11 }
  0xf9   :  { %592 = vst [vmem:[%s1272_s3 + $0x158] sm:$0xff] %v497_v8 }
  0xfa   :  { %608 = vst [vmem:[%s1272_s3 + $0x1d8] sm:$0xff] %v537_v9 }
  0xfb   :  { %561 = vst [vmem:[%s1272_s3 + $0x60] sm:$0xff] %v420_v12 }
  0xfc   :  { %577 = vst [vmem:[%s1272_s3 + $0xe0] sm:$0xff] %v460_v13 }
  0xfe   :  { %v499_v14 = vpop.f32.mrf.mxu2  ;;  %v539_v15 = vpop.f32.mrf.mxu3 }
  0xff   :  { %v500_v16 = vadd.f32 %v1011_v40, %v499_v14  ;;  %v540_v17 = vadd.f32 %v1011_v40, %v539_v15  ;;  %v421_v18 = vpop.f32.mrf.mxu0  ;;  %v461_v19 = vpop.f32.mrf.mxu1 }
 0x100   :  { %v422_v20 = vadd.f32 %v1011_v40, %v421_v18  ;;  %v462_v21 = vadd.f32 %v1011_v40, %v461_v19 }
 0x101   :  { %593 = vst [vmem:[%s1272_s3 + $0x160] sm:$0xff] %v500_v16 }
 0x102   :  { %609 = vst [vmem:[%s1272_s3 + $0x1e0] sm:$0xff] %v540_v17 }
 0x103   :  { %562 = vst [vmem:[%s1272_s3 + $0x68] sm:$0xff] %v422_v20 }
 0x104   :  { %578 = vst [vmem:[%s1272_s3 + $0xe8] sm:$0xff] %v462_v21 }
 0x106   :  { %v501_v22 = vpop.f32.mrf.mxu2  ;;  %v541_v23 = vpop.f32.mrf.mxu3 }
 0x107   :  { %v502_v24 = vadd.f32 %v1011_v40, %v501_v22  ;;  %v542_v25 = vadd.f32 %v1011_v40, %v541_v23  ;;  %v424_v26 = vpop.f32.mrf.mxu0  ;;  %v464_v27 = vpop.f32.mrf.mxu1 }
 0x108   :  { %v425_v28 = vadd.f32 %v1011_v40, %v424_v26  ;;  %v465_v29 = vadd.f32 %v1011_v40, %v464_v27 }
 0x109   :  { %594 = vst [vmem:[%s1272_s3 + $0x168] sm:$0xff] %v502_v24 }
 0x10a   :  { %610 = vst [vmem:[%s1272_s3 + $0x1e8] sm:$0xff] %v542_v25 }
 0x10b   :  { %563 = vst [vmem:[%s1272_s3 + $0x70] sm:$0xff] %v425_v28 }
 0x10c   :  { %579 = vst [vmem:[%s1272_s3 + $0xf0] sm:$0xff] %v465_v29 }
 0x10e   :  { %v504_v30 = vpop.f32.mrf.mxu2  ;;  %v544_v31 = vpop.f32.mrf.mxu3 }
 0x10f   :  { %v505_v32 = vadd.f32 %v1011_v40, %v504_v30  ;;  %v545_v33 = vadd.f32 %v1011_v40, %v544_v31  ;;  %v426_v34 = vpop.f32.mrf.mxu0  ;;  %v466_v35 = vpop.f32.mrf.mxu1 }
 0x110   :  { %v427_v36 = vadd.f32 %v1011_v40, %v426_v34  ;;  %v467_v37 = vadd.f32 %v1011_v40, %v466_v35 }
 0x111   :  { %595 = vst [vmem:[%s1272_s3 + $0x170] sm:$0xff] %v505_v32 }
 0x112   :  { %611 = vst [vmem:[%s1272_s3 + $0x1f0] sm:$0xff] %v545_v33 }
 0x113   :  { %564 = vst [vmem:[%s1272_s3 + $0x78] sm:$0xff] %v427_v36 }
 0x114   :  { %580 = vst [vmem:[%s1272_s3 + $0xf8] sm:$0xff] %v467_v37 }
 0x116   :  { %v506_v38 = vpop.f32.mrf.mxu2  ;;  %v546_v39 = vpop.f32.mrf.mxu3 }
 0x117   :  { %v507_v41 = vadd.f32 %v1011_v40, %v506_v38  ;;  %v547_v42 = vadd.f32 %v1011_v40, %v546_v39 }
 0x119   :  { %596 = vst [vmem:[%s1272_s3 + $0x178] sm:$0xff] %v507_v41 }
 0x11a   :  { %612 = vst [vmem:[%s1272_s3 + $0x1f8] sm:$0xff] %v547_v42 }

</bundles_post_ra>
